<compile_context>
chip_gen: v7x
topology: tpu7x:2x2x1
jax: 0.10.0
libtpu: 0.0.40
codegen_flags: <defaults>
</compile_context>

<pallas_src>
import functools
import math

import jax
import jax.numpy as jnp
from jax.experimental import pallas as pl
from jax.experimental.pallas import tpu as pltpu


# --------------------------------------------------------------------------
# Fused kernel: wide QKV projection (once per batch) + per-head attention
# with fused per-head W_o accumulation.
# --------------------------------------------------------------------------
def _mha_kernel(x_ref, wq_ref, bq_ref, wk_ref, bk_ref, wv_ref, bv_ref,
                wo_ref, bo_ref, out_ref, *rest,
                h, q_dim, v_dim, causal, mxu_dtype, has_score):
    # x_ref:   (1, T, d_model)  block for batch b (fetched once per b)
    # wq/wk:   (d_model, h*q)   grid-resident, mxu_dtype (scale folded into wq)
    # wv:      (d_model, h*v)   grid-resident, mxu_dtype
    # wo_ref:  (v_dim, d_model) per-head tile, mxu_dtype
    # out_ref: (1, T, d_model)  f32, resident accumulator across the head axis
    # rest:    [score_ref?] + [q_scr, k_scr, v_scr] + [mask_scr?]
    idx = 0
    score_ref = rest[idx] if has_score else None
    if has_score:
        idx += 1
    q_scr, k_scr, v_scr = rest[idx], rest[idx + 1], rest[idx + 2]
    idx += 3
    mask_scr = rest[idx] if causal else None

    hd = pl.program_id(1)
    T = x_ref.shape[1]

    # ---- once per batch element: wide QKV projection, output/mask init ----
    @pl.when(hd == 0)
    def _init():
        x = x_ref[0].astype(mxu_dtype)                           # (T, d_model)
        qw = jnp.dot(x, wq_ref[...],
                     preferred_element_type=jnp.float32) + bq_ref[...]
        kw = jnp.dot(x, wk_ref[...],
                     preferred_element_type=jnp.float32) + bk_ref[...]
        vw = jnp.dot(x, wv_ref[...],
                     preferred_element_type=jnp.float32) + bv_ref[...]
        for i in range(h):                       # static unroll, static slices
            q_scr[i] = qw[:, i * q_dim:(i + 1) * q_dim].astype(q_scr.dtype)
            k_scr[i] = kw[:, i * q_dim:(i + 1) * q_dim].astype(k_scr.dtype)
            v_scr[i] = vw[:, i * v_dim:(i + 1) * v_dim].astype(v_scr.dtype)
        # Initialise the resident output accumulator with the W_o bias.
        out_ref[0] = jnp.broadcast_to(bo_ref[...], (T, bo_ref.shape[-1]))
        if causal:
            row = jax.lax.broadcasted_iota(jnp.int32, (T, T), 0)
            col = jax.lax.broadcasted_iota(jnp.int32, (T, T), 1)
            mask_scr[...] = jnp.where(row >= col, jnp.float32(0.0),
                                      jnp.float32(-(2.0 ** 32) + 1.0))

    # ---- per head (one grid step each) ----
    qh = q_scr[hd]                               # (T, q_dim), mxu_dtype
    kh = k_scr[hd]
    vh = v_scr[hd]

    # 1/sqrt(q) is pre-folded into Wq/bq, so this IS score = Q K^T / sqrt(q).
    s = jax.lax.dot_general(qh, kh, (((1,), (1,)), ((), ())),
                            preferred_element_type=jnp.float32)   # (T, T)

    if has_score:
        # torch stores the scaled, PRE-mask score.
        score_ref[0, 0] = s.astype(score_ref.dtype)

    if causal:
        # Additive huge-negative bias: identical post-softmax to the torch
        # `where` mask (exp underflows to exactly 0 in f32 either way).
        s = s + mask_scr[...]

    # Softmax in f32 (VPU/EUP/XLU path).
    m = jnp.max(s, axis=-1, keepdims=True)
    e = jnp.exp(s - m)
    p = e * pl.reciprocal(jnp.sum(e, axis=-1, keepdims=True), approx=True)

    # Per-head attention output, immediately projected by this head's W_o
    # slice and accumulated into the resident f32 output block.
    pv = jnp.dot(p.astype(mxu_dtype), vh, preferred_element_type=jnp.float32)
    out_ref[0] += jnp.dot(pv.astype(mxu_dtype), wo_ref[...],
                          preferred_element_type=jnp.float32)

    # TODO(synk): for return_score=False and long T, add flash-style KV
    # tiling (inner "arbitrary" KV axis with running m/l scratch) so no T^2
    # temporaries are materialised.


# --------------------------------------------------------------------------
# VMEM budgeting helpers
# --------------------------------------------------------------------------
def _round_up(x, m):
    return ((x + m - 1) // m) * m


def _padded_bytes(shape, dtype):
    """Rough (8,128)-tiled upper bound on one buffer's VMEM footprint."""
    itemsize = jnp.dtype(dtype).itemsize
    if len(shape) < 2:
        return max(_round_up(int(math.prod(shape)) * itemsize, 512), 512)
    lead = 1
    for d in shape[:-2]:
        lead *= int(d)
    sub = _round_up(int(shape[-2]), 8)
    lane = _round_up(int(shape[-1]), 128)
    return lead * sub * lane * itemsize


def _estimate_vmem_bytes(*, T, d_model, h, q_dim, v_dim, x_dtype, mxu_dtype,
                         score_dtype, return_score, causal):
    est = 0
    # Double-buffered pipeline blocks.
    est += 2 * _padded_bytes((1, T, d_model), x_dtype)                 # x
    est += 2 * _padded_bytes((1, T, d_model), jnp.float32)             # out
    est += 2 * (2 * _padded_bytes((d_model, h * q_dim), mxu_dtype)
                + _padded_bytes((d_model, h * v_dim), mxu_dtype))      # Wq/Wk/Wv
    est += 2 * _padded_bytes((v_dim, d_model), mxu_dtype)              # Wo tile
    est += 2 * (2 * _padded_bytes((1, h * q_dim), jnp.float32)
                + _padded_bytes((1, h * v_dim), jnp.float32)
                + _padded_bytes((1, d_model), jnp.float32))            # biases
    if return_score:
        est += 2 * _padded_bytes((1, 1, T, T), score_dtype)            # score
    # Persistent scratch.
    est += 2 * _padded_bytes((h, T, q_dim), mxu_dtype)                 # Q, K
    est += _padded_bytes((h, T, v_dim), mxu_dtype)                     # V
    if causal:
        est += _padded_bytes((T, T), jnp.float32)                      # mask
    # Live temporaries: wide QKV f32 during init + softmax temps (s, e, p).
    est += 3 * _padded_bytes((T, max(h * q_dim, h * v_dim)), jnp.float32)
    est += 4 * _padded_bytes((T, T), jnp.float32)
    # Headroom; never below the 32 MiB scoped default, never above v7x's
    # 64 MiB physical VMEM.
    return int(min(max(int(est * 1.5) + (8 << 20), 32 << 20), 64 << 20))


# --------------------------------------------------------------------------
# Wrapper
# --------------------------------------------------------------------------
def multi_head_attention(x, params, *, h, q_dim, v_dim,
                         mask=False, stage='test', padding_mask=None,
                         return_score=True, mxu_dtype=jnp.bfloat16,
                         score_dtype=jnp.float32, vmem_limit_bytes=None):
    """Returns (self_attention, score) exactly like the torch module.

    self_attention: (B, T, d_model) f32
    score:          (h*B, T, T) scaled QK^T, pre-mask/pre-softmax
                    (or None when return_score=False)
    """
    # TODO(synk): padding_mask path not implemented (the torch code's
    # view(-1, T, T) mixes batch-major mask ordering with head-major scores).
    assert padding_mask is None

    B, T, d_model = x.shape
    causal = bool(mask) and (stage == 'train')
    scale = 1.0 / math.sqrt(q_dim)
    f32 = jnp.float32

    # torch Linear: y = x @ W.T + b; chunk(h, dim=-1) takes consecutive column
    # groups of size q/v, so W_o's input features are head-major row groups
    # after transpose.  1/sqrt(q) is folded into Wq and bq here.
    wq = (params['Wq_w'].astype(f32).T * scale).astype(mxu_dtype)   # (d_model, h*q)
    bq = (params['Wq_b'].astype(f32) * scale).reshape(1, h * q_dim)
    wk = params['Wk_w'].astype(f32).T.astype(mxu_dtype)             # (d_model, h*q)
    bk = params['Wk_b'].astype(f32).reshape(1, h * q_dim)
    wv = params['Wv_w'].astype(f32).T.astype(mxu_dtype)             # (d_model, h*v)
    bv = params['Wv_b'].astype(f32).reshape(1, h * v_dim)
    wo = params['Wo_w'].astype(f32).T.astype(mxu_dtype)             # (h*v, d_model)
    bo = params['Wo_b'].astype(f32).reshape(1, d_model)

    kernel = functools.partial(_mha_kernel, h=h, q_dim=q_dim, v_dim=v_dim,
                               causal=causal, mxu_dtype=mxu_dtype,
                               has_score=return_score)

    in_specs = [
        pl.BlockSpec((1, T, d_model), lambda b, hd: (b, 0, 0)),      # x
        pl.BlockSpec((d_model, h * q_dim), lambda b, hd: (0, 0)),    # Wq (resident)
        pl.BlockSpec((1, h * q_dim), lambda b, hd: (0, 0)),          # bq
        pl.BlockSpec((d_model, h * q_dim), lambda b, hd: (0, 0)),    # Wk
        pl.BlockSpec((1, h * q_dim), lambda b, hd: (0, 0)),          # bk
        pl.BlockSpec((d_model, h * v_dim), lambda b, hd: (0, 0)),    # Wv
        pl.BlockSpec((1, h * v_dim), lambda b, hd: (0, 0)),          # bv
        pl.BlockSpec((v_dim, d_model), lambda b, hd: (hd, 0)),       # Wo per head
        pl.BlockSpec((1, d_model), lambda b, hd: (0, 0)),            # bo
    ]

    out_shapes = [jax.ShapeDtypeStruct((B, T, d_model), jnp.float32)]
    out_specs = [pl.BlockSpec((1, T, d_model), lambda b, hd: (b, 0, 0))]
    if return_score:
        # (h, B, T, T) reshapes for free to torch's head-major (h*B, T, T).
        out_shapes.append(jax.ShapeDtypeStruct((h, B, T, T), score_dtype))
        out_specs.append(pl.BlockSpec((1, 1, T, T),
                                      lambda b, hd: (hd, b, 0, 0)))

    scratch_shapes = [
        pltpu.VMEM((h, T, q_dim), mxu_dtype),   # Q, head-major
        pltpu.VMEM((h, T, q_dim), mxu_dtype),   # K
        pltpu.VMEM((h, T, v_dim), mxu_dtype),   # V
    ]
    if causal:
        scratch_shapes.append(pltpu.VMEM((T, T), jnp.float32))   # additive mask

    if vmem_limit_bytes is None:
        vmem_limit_bytes = _estimate_vmem_bytes(
            T=T, d_model=d_model, h=h, q_dim=q_dim, v_dim=v_dim,
            x_dtype=x.dtype, mxu_dtype=mxu_dtype, score_dtype=score_dtype,
            return_score=return_score, causal=causal)

    results = pl.pallas_call(
        kernel,
        out_shape=tuple(out_shapes),
        grid_spec=pltpu.PrefetchScalarGridSpec(
            num_scalar_prefetch=0,
            grid=(B, h),
            in_specs=in_specs,
            out_specs=out_specs,
            scratch_shapes=scratch_shapes,
        ),
        compiler_params=pltpu.CompilerParams(
            # Batch axis is megacore-parallel; the head axis carries the QKV
            # scratch + output-accumulator dependence so it stays "arbitrary".
            # TODO(synk): when B == 1 on v7x, add a parallel query-tile axis
            # so the second TensorCore is not idle.
            dimension_semantics=("parallel", "arbitrary"),
            vmem_limit_bytes=int(vmem_limit_bytes)),
    )(x, wq, bq, wk, bk, wv, bv, wo, bo)

    if return_score:
        out, score_hb = results
        return out, score_hb.reshape(h * B, T, T)
    return results[0], None


# --------------------------------------------------------------------------
# Pure-JAX reference (mirrors the torch forward)
# --------------------------------------------------------------------------
def _reference(x, params, *, h, q_dim, v_dim, causal=False):
    B, T, d_model = x.shape
    Q = x @ params['Wq_w'].T + params['Wq_b']        # (B, T, q*h)
    K = x @ params['Wk_w'].T + params['Wk_b']
    V = x @ params['Wv_w'].T + params['Wv_b']

    def chunk_cat(M, d):   # cat(chunk(h, dim=-1), dim=0)
        return jnp.concatenate([M[..., i * d:(i + 1) * d] for i in range(h)],
                               axis=0)

    Qh, Kh, Vh = chunk_cat(Q, q_dim), chunk_cat(K, q_dim), chunk_cat(V, v_dim)
    score = jnp.einsum('btq,bsq->bts', Qh, Kh) / math.sqrt(q_dim)   # (h*B, T, T)
    raw_score = score
    if causal:
        tril = jnp.tril(jnp.ones((T, T), jnp.float32))
        score = jnp.where(tril > 0, score, jnp.float32(-(2.0 ** 32) + 1.0))
    p = jax.nn.softmax(score, axis=-1)
    attn = jnp.einsum('bts,bsv->btv', p, Vh)                        # (h*B, T, v)
    heads = jnp.concatenate([attn[i * B:(i + 1) * B] for i in range(h)],
                            axis=-1)
    out = heads @ params['Wo_w'].T + params['Wo_b']
    return out, raw_score


if __name__ == "__main__":
    B, T, d_model, q_dim, v_dim, h = 2, 8, 32, 8, 8, 4

    key = jax.random.PRNGKey(0)
    ks = jax.random.split(key, 9)

    def linear_init(kw, kb, out_f, in_f):
        bound = 1.0 / math.sqrt(in_f)
        w = jax.random.uniform(kw, (out_f, in_f), jnp.float32, -bound, bound)
        b = jax.random.uniform(kb, (out_f,), jnp.float32, -bound, bound)
        return w, b

    Wq_w, Wq_b = linear_init(ks[0], ks[1], q_dim * h, d_model)
    Wk_w, Wk_b = linear_init(ks[2], ks[3], q_dim * h, d_model)
    Wv_w, Wv_b = linear_init(ks[4], ks[5], v_dim * h, d_model)
    Wo_w, Wo_b = linear_init(ks[6], ks[7], d_model, v_dim * h)

    params = dict(Wq_w=Wq_w, Wq_b=Wq_b, Wk_w=Wk_w, Wk_b=Wk_b,
                  Wv_w=Wv_w, Wv_b=Wv_b, Wo_w=Wo_w, Wo_b=Wo_b)

    x = jax.random.normal(ks[8], (B, T, d_model), jnp.float32)

    # 1) no-mask / test path, f32 MXU operands for tight parity.
    out, score = multi_head_attention(
        x, params, h=h, q_dim=q_dim, v_dim=v_dim,
        mask=False, stage='test', padding_mask=None, mxu_dtype=jnp.float32)
    jax.block_until_ready((out, score))

    ref_out, ref_score = _reference(x, params, h=h, q_dim=q_dim, v_dim=v_dim,
                                    causal=False)
    assert out.shape == (B, T, d_model) and score.shape == (h * B, T, T)
    # out tolerance slightly loose because of pl.reciprocal(approx=True).
    assert jnp.allclose(out, ref_out, atol=2e-3, rtol=2e-3)
    assert jnp.allclose(score, ref_score, atol=1e-4, rtol=1e-4)

    # 2) causal-mask / train path, f32 MXU operands.
    out_c, score_c = multi_head_attention(
        x, params, h=h, q_dim=q_dim, v_dim=v_dim,
        mask=True, stage='train', padding_mask=None, mxu_dtype=jnp.float32)
    jax.block_until_ready((out_c, score_c))

    ref_out_c, ref_score_c = _reference(x, params, h=h, q_dim=q_dim,
                                        v_dim=v_dim, causal=True)
    assert jnp.allclose(out_c, ref_out_c, atol=2e-3, rtol=2e-3)
    assert jnp.allclose(score_c, ref_score_c, atol=1e-4, rtol=1e-4)

    # 3) default bf16-MXU path (f32 accumulation) — looser tolerance.
    out_b, score_b = multi_head_attention(
        x, params, h=h, q_dim=q_dim, v_dim=v_dim,
        mask=True, stage='train', padding_mask=None)
    jax.block_until_ready((out_b, score_b))
    assert jnp.allclose(out_b, ref_out_c, atol=5e-2, rtol=5e-2)
    assert jnp.allclose(score_b, ref_score_c, atol=5e-2, rtol=5e-2)

    print("KERNEL_OK")
</pallas_src>

<mosaic_0001>
module attributes {stable_mosaic.version = 11 : i64} {
  func.func @_mha_kernel(%arg0: i32, %arg1: i32, %arg2: memref<1x8x32xf32, #tpu.memory_space<vmem>>, %arg3: memref<32x32xf32, #tpu.memory_space<vmem>>, %arg4: memref<1x32xf32, #tpu.memory_space<vmem>>, %arg5: memref<32x32xf32, #tpu.memory_space<vmem>>, %arg6: memref<1x32xf32, #tpu.memory_space<vmem>>, %arg7: memref<32x32xf32, #tpu.memory_space<vmem>>, %arg8: memref<1x32xf32, #tpu.memory_space<vmem>>, %arg9: memref<8x32xf32, #tpu.memory_space<vmem>>, %arg10: memref<1x32xf32, #tpu.memory_space<vmem>>, %arg11: memref<1x8x32xf32, #tpu.memory_space<vmem>>, %arg12: memref<1x1x8x8xf32, #tpu.memory_space<vmem>>, %arg13: memref<4x8x8xf32, #tpu.memory_space<vmem>>, %arg14: memref<4x8x8xf32, #tpu.memory_space<vmem>>, %arg15: memref<4x8x8xf32, #tpu.memory_space<vmem>>) attributes {dimension_semantics = [#tpu.dimension_semantics<parallel>, #tpu.dimension_semantics<arbitrary>], iteration_bounds = array<i64: 2, 4>, scalar_prefetch = 0 : i64, scratch_operands = 3 : i64, tpu.core_type = #tpu.core_type<tc>, window_params = [{transform_indices = @transform_0, window_bounds = array<i64: 1, 8, 32>}, {pipeline_mode = #tpu.pipeline_mode<synchronous>, transform_indices = @transform_1, window_bounds = array<i64: 32, 32>}, {pipeline_mode = #tpu.pipeline_mode<synchronous>, transform_indices = @transform_2, window_bounds = array<i64: 1, 32>}, {pipeline_mode = #tpu.pipeline_mode<synchronous>, transform_indices = @transform_3, window_bounds = array<i64: 32, 32>}, {pipeline_mode = #tpu.pipeline_mode<synchronous>, transform_indices = @transform_4, window_bounds = array<i64: 1, 32>}, {pipeline_mode = #tpu.pipeline_mode<synchronous>, transform_indices = @transform_5, window_bounds = array<i64: 32, 32>}, {pipeline_mode = #tpu.pipeline_mode<synchronous>, transform_indices = @transform_6, window_bounds = array<i64: 1, 32>}, {transform_indices = @transform_7, window_bounds = array<i64: 8, 32>}, {pipeline_mode = #tpu.pipeline_mode<synchronous>, transform_indices = @transform_8, window_bounds = array<i64: 1, 32>}, {transform_indices = @transform_9, window_bounds = array<i64: 1, 8, 32>}, {transform_indices = @transform_10, window_bounds = array<i64: 1, 1, 8, 8>}]} {
    %c0_i32 = arith.constant 0 : i32
    %0 = arith.cmpi eq, %arg1, %c0_i32 : i32
    %1 = arith.extui %0 : i1 to i32
    %c0_i32_0 = arith.constant 0 : i32
    %2 = arith.cmpi ne, %1, %c0_i32_0 : i32
    scf.if %2 {
      %c0_22 = arith.constant 0 : index
      %c0_23 = arith.constant 0 : index
      %c0_24 = arith.constant 0 : index
      %35 = vector.load %arg2[%c0_22, %c0_23, %c0_24] : memref<1x8x32xf32, #tpu.memory_space<vmem>>, vector<1x8x32xf32>
      %36 = vector.shape_cast %35 : vector<1x8x32xf32> to vector<8x32xf32>
      %c0_25 = arith.constant 0 : index
      %c0_26 = arith.constant 0 : index
      %37 = vector.load %arg3[%c0_25, %c0_26] : memref<32x32xf32, #tpu.memory_space<vmem>>, vector<32x32xf32>
      %cst_27 = arith.constant dense<0.000000e+00> : vector<8x32xf32>
      %38 = tpu.matmul %36, %37, %cst_27 {dimension_numbers = #tpu.dot_dimension_numbers<[1], [0], [0], [1], [0, 0, 1, 1], [], []>} : vector<8x32xf32>, vector<32x32xf32>, vector<8x32xf32> -> vector<8x32xf32>
      %c0_28 = arith.constant 0 : index
      %c0_29 = arith.constant 0 : index
      %39 = vector.load %arg4[%c0_28, %c0_29] : memref<1x32xf32, #tpu.memory_space<vmem>>, vector<1x32xf32>
      %40 = vector.broadcast %39 : vector<1x32xf32> to vector<8x32xf32>
      %41 = arith.addf %38, %40 : vector<8x32xf32>
      %c0_30 = arith.constant 0 : index
      %c0_31 = arith.constant 0 : index
      %42 = vector.load %arg5[%c0_30, %c0_31] : memref<32x32xf32, #tpu.memory_space<vmem>>, vector<32x32xf32>
      %cst_32 = arith.constant dense<0.000000e+00> : vector<8x32xf32>
      %43 = tpu.matmul %36, %42, %cst_32 {dimension_numbers = #tpu.dot_dimension_numbers<[1], [0], [0], [1], [0, 0, 1, 1], [], []>} : vector<8x32xf32>, vector<32x32xf32>, vector<8x32xf32> -> vector<8x32xf32>
      %c0_33 = arith.constant 0 : index
      %c0_34 = arith.constant 0 : index
      %44 = vector.load %arg6[%c0_33, %c0_34] : memref<1x32xf32, #tpu.memory_space<vmem>>, vector<1x32xf32>
      %45 = vector.broadcast %44 : vector<1x32xf32> to vector<8x32xf32>
      %46 = arith.addf %43, %45 : vector<8x32xf32>
      %c0_35 = arith.constant 0 : index
      %c0_36 = arith.constant 0 : index
      %47 = vector.load %arg7[%c0_35, %c0_36] : memref<32x32xf32, #tpu.memory_space<vmem>>, vector<32x32xf32>
      %cst_37 = arith.constant dense<0.000000e+00> : vector<8x32xf32>
      %48 = tpu.matmul %36, %47, %cst_37 {dimension_numbers = #tpu.dot_dimension_numbers<[1], [0], [0], [1], [0, 0, 1, 1], [], []>} : vector<8x32xf32>, vector<32x32xf32>, vector<8x32xf32> -> vector<8x32xf32>
      %c0_38 = arith.constant 0 : index
      %c0_39 = arith.constant 0 : index
      %49 = vector.load %arg8[%c0_38, %c0_39] : memref<1x32xf32, #tpu.memory_space<vmem>>, vector<1x32xf32>
      %50 = vector.broadcast %49 : vector<1x32xf32> to vector<8x32xf32>
      %51 = arith.addf %48, %50 : vector<8x32xf32>
      %52 = vector.extract_strided_slice %41 {offsets = [0, 0], sizes = [8, 8], strides = [1, 1]} : vector<8x32xf32> to vector<8x8xf32>
      %c0_40 = arith.constant 0 : index
      %c0_41 = arith.constant 0 : index
      %c0_42 = arith.constant 0 : index
      %53 = vector.load %arg13[%c0_40, %c0_41, %c0_42] : memref<4x8x8xf32, #tpu.memory_space<vmem>>, vector<1x8x8xf32>
      %54 = vector.shape_cast %53 : vector<1x8x8xf32> to vector<8x8xf32>
      %55 = vector.shape_cast %52 : vector<8x8xf32> to vector<1x8x8xf32>
      tpu.vector_store %arg13[%c0_40, %c0_41, %c0_42], %55 {strides = array<i32>} : memref<4x8x8xf32, #tpu.memory_space<vmem>>, vector<1x8x8xf32>,
      %56 = vector.extract_strided_slice %46 {offsets = [0, 0], sizes = [8, 8], strides = [1, 1]} : vector<8x32xf32> to vector<8x8xf32>
      %c0_43 = arith.constant 0 : index
      %c0_44 = arith.constant 0 : index
      %c0_45 = arith.constant 0 : index
      %57 = vector.load %arg14[%c0_43, %c0_44, %c0_45] : memref<4x8x8xf32, #tpu.memory_space<vmem>>, vector<1x8x8xf32>
      %58 = vector.shape_cast %57 : vector<1x8x8xf32> to vector<8x8xf32>
      %59 = vector.shape_cast %56 : vector<8x8xf32> to vector<1x8x8xf32>
      tpu.vector_store %arg14[%c0_43, %c0_44, %c0_45], %59 {strides = array<i32>} : memref<4x8x8xf32, #tpu.memory_space<vmem>>, vector<1x8x8xf32>,
      %60 = vector.extract_strided_slice %51 {offsets = [0, 0], sizes = [8, 8], strides = [1, 1]} : vector<8x32xf32> to vector<8x8xf32>
      %c0_46 = arith.constant 0 : index
      %c0_47 = arith.constant 0 : index
      %c0_48 = arith.constant 0 : index
      %61 = vector.load %arg15[%c0_46, %c0_47, %c0_48] : memref<4x8x8xf32, #tpu.memory_space<vmem>>, vector<1x8x8xf32>
      %62 = vector.shape_cast %61 : vector<1x8x8xf32> to vector<8x8xf32>
      %63 = vector.shape_cast %60 : vector<8x8xf32> to vector<1x8x8xf32>
      tpu.vector_store %arg15[%c0_46, %c0_47, %c0_48], %63 {strides = array<i32>} : memref<4x8x8xf32, #tpu.memory_space<vmem>>, vector<1x8x8xf32>,
      %64 = vector.extract_strided_slice %41 {offsets = [0, 8], sizes = [8, 8], strides = [1, 1]} : vector<8x32xf32> to vector<8x8xf32>
      %c1 = arith.constant 1 : index
      %c0_49 = arith.constant 0 : index
      %c0_50 = arith.constant 0 : index
      %65 = vector.load %arg13[%c1, %c0_49, %c0_50] : memref<4x8x8xf32, #tpu.memory_space<vmem>>, vector<1x8x8xf32>
      %66 = vector.shape_cast %65 : vector<1x8x8xf32> to vector<8x8xf32>
      %67 = vector.shape_cast %64 : vector<8x8xf32> to vector<1x8x8xf32>
      tpu.vector_store %arg13[%c1, %c0_49, %c0_50], %67 {strides = array<i32>} : memref<4x8x8xf32, #tpu.memory_space<vmem>>, vector<1x8x8xf32>,
      %68 = vector.extract_strided_slice %46 {offsets = [0, 8], sizes = [8, 8], strides = [1, 1]} : vector<8x32xf32> to vector<8x8xf32>
      %c1_51 = arith.constant 1 : index
      %c0_52 = arith.constant 0 : index
      %c0_53 = arith.constant 0 : index
      %69 = vector.load %arg14[%c1_51, %c0_52, %c0_53] : memref<4x8x8xf32, #tpu.memory_space<vmem>>, vector<1x8x8xf32>
      %70 = vector.shape_cast %69 : vector<1x8x8xf32> to vector<8x8xf32>
      %71 = vector.shape_cast %68 : vector<8x8xf32> to vector<1x8x8xf32>
      tpu.vector_store %arg14[%c1_51, %c0_52, %c0_53], %71 {strides = array<i32>} : memref<4x8x8xf32, #tpu.memory_space<vmem>>, vector<1x8x8xf32>,
      %72 = vector.extract_strided_slice %51 {offsets = [0, 8], sizes = [8, 8], strides = [1, 1]} : vector<8x32xf32> to vector<8x8xf32>
      %c1_54 = arith.constant 1 : index
      %c0_55 = arith.constant 0 : index
      %c0_56 = arith.constant 0 : index
      %73 = vector.load %arg15[%c1_54, %c0_55, %c0_56] : memref<4x8x8xf32, #tpu.memory_space<vmem>>, vector<1x8x8xf32>
      %74 = vector.shape_cast %73 : vector<1x8x8xf32> to vector<8x8xf32>
      %75 = vector.shape_cast %72 : vector<8x8xf32> to vector<1x8x8xf32>
      tpu.vector_store %arg15[%c1_54, %c0_55, %c0_56], %75 {strides = array<i32>} : memref<4x8x8xf32, #tpu.memory_space<vmem>>, vector<1x8x8xf32>,
      %76 = vector.extract_strided_slice %41 {offsets = [0, 16], sizes = [8, 8], strides = [1, 1]} : vector<8x32xf32> to vector<8x8xf32>
      %c2 = arith.constant 2 : index
      %c0_57 = arith.constant 0 : index
      %c0_58 = arith.constant 0 : index
      %77 = vector.load %arg13[%c2, %c0_57, %c0_58] : memref<4x8x8xf32, #tpu.memory_space<vmem>>, vector<1x8x8xf32>
      %78 = vector.shape_cast %77 : vector<1x8x8xf32> to vector<8x8xf32>
      %79 = vector.shape_cast %76 : vector<8x8xf32> to vector<1x8x8xf32>
      tpu.vector_store %arg13[%c2, %c0_57, %c0_58], %79 {strides = array<i32>} : memref<4x8x8xf32, #tpu.memory_space<vmem>>, vector<1x8x8xf32>,
      %80 = vector.extract_strided_slice %46 {offsets = [0, 16], sizes = [8, 8], strides = [1, 1]} : vector<8x32xf32> to vector<8x8xf32>
      %c2_59 = arith.constant 2 : index
      %c0_60 = arith.constant 0 : index
      %c0_61 = arith.constant 0 : index
      %81 = vector.load %arg14[%c2_59, %c0_60, %c0_61] : memref<4x8x8xf32, #tpu.memory_space<vmem>>, vector<1x8x8xf32>
      %82 = vector.shape_cast %81 : vector<1x8x8xf32> to vector<8x8xf32>
      %83 = vector.shape_cast %80 : vector<8x8xf32> to vector<1x8x8xf32>
      tpu.vector_store %arg14[%c2_59, %c0_60, %c0_61], %83 {strides = array<i32>} : memref<4x8x8xf32, #tpu.memory_space<vmem>>, vector<1x8x8xf32>,
      %84 = vector.extract_strided_slice %51 {offsets = [0, 16], sizes = [8, 8], strides = [1, 1]} : vector<8x32xf32> to vector<8x8xf32>
      %c2_62 = arith.constant 2 : index
      %c0_63 = arith.constant 0 : index
      %c0_64 = arith.constant 0 : index
      %85 = vector.load %arg15[%c2_62, %c0_63, %c0_64] : memref<4x8x8xf32, #tpu.memory_space<vmem>>, vector<1x8x8xf32>
      %86 = vector.shape_cast %85 : vector<1x8x8xf32> to vector<8x8xf32>
      %87 = vector.shape_cast %84 : vector<8x8xf32> to vector<1x8x8xf32>
      tpu.vector_store %arg15[%c2_62, %c0_63, %c0_64], %87 {strides = array<i32>} : memref<4x8x8xf32, #tpu.memory_space<vmem>>, vector<1x8x8xf32>,
      %88 = vector.extract_strided_slice %41 {offsets = [0, 24], sizes = [8, 8], strides = [1, 1]} : vector<8x32xf32> to vector<8x8xf32>
      %c3 = arith.constant 3 : index
      %c0_65 = arith.constant 0 : index
      %c0_66 = arith.constant 0 : index
      %89 = vector.load %arg13[%c3, %c0_65, %c0_66] : memref<4x8x8xf32, #tpu.memory_space<vmem>>, vector<1x8x8xf32>
      %90 = vector.shape_cast %89 : vector<1x8x8xf32> to vector<8x8xf32>
      %91 = vector.shape_cast %88 : vector<8x8xf32> to vector<1x8x8xf32>
      tpu.vector_store %arg13[%c3, %c0_65, %c0_66], %91 {strides = array<i32>} : memref<4x8x8xf32, #tpu.memory_space<vmem>>, vector<1x8x8xf32>,
      %92 = vector.extract_strided_slice %46 {offsets = [0, 24], sizes = [8, 8], strides = [1, 1]} : vector<8x32xf32> to vector<8x8xf32>
      %c3_67 = arith.constant 3 : index
      %c0_68 = arith.constant 0 : index
      %c0_69 = arith.constant 0 : index
      %93 = vector.load %arg14[%c3_67, %c0_68, %c0_69] : memref<4x8x8xf32, #tpu.memory_space<vmem>>, vector<1x8x8xf32>
      %94 = vector.shape_cast %93 : vector<1x8x8xf32> to vector<8x8xf32>
      %95 = vector.shape_cast %92 : vector<8x8xf32> to vector<1x8x8xf32>
      tpu.vector_store %arg14[%c3_67, %c0_68, %c0_69], %95 {strides = array<i32>} : memref<4x8x8xf32, #tpu.memory_space<vmem>>, vector<1x8x8xf32>,
      %96 = vector.extract_strided_slice %51 {offsets = [0, 24], sizes = [8, 8], strides = [1, 1]} : vector<8x32xf32> to vector<8x8xf32>
      %c3_70 = arith.constant 3 : index
      %c0_71 = arith.constant 0 : index
      %c0_72 = arith.constant 0 : index
      %97 = vector.load %arg15[%c3_70, %c0_71, %c0_72] : memref<4x8x8xf32, #tpu.memory_space<vmem>>, vector<1x8x8xf32>
      %98 = vector.shape_cast %97 : vector<1x8x8xf32> to vector<8x8xf32>
      %99 = vector.shape_cast %96 : vector<8x8xf32> to vector<1x8x8xf32>
      tpu.vector_store %arg15[%c3_70, %c0_71, %c0_72], %99 {strides = array<i32>} : memref<4x8x8xf32, #tpu.memory_space<vmem>>, vector<1x8x8xf32>,
      %c0_73 = arith.constant 0 : index
      %c0_74 = arith.constant 0 : index
      %100 = vector.load %arg10[%c0_73, %c0_74] : memref<1x32xf32, #tpu.memory_space<vmem>>, vector<1x32xf32>
      %101 = vector.shape_cast %100 : vector<1x32xf32> to vector<1x32xf32>
      %102 = vector.broadcast %101 : vector<1x32xf32> to vector<8x32xf32>
      %c0_75 = arith.constant 0 : index
      %c0_76 = arith.constant 0 : index
      %c0_77 = arith.constant 0 : index
      %103 = vector.load %arg11[%c0_75, %c0_76, %c0_77] : memref<1x8x32xf32, #tpu.memory_space<vmem>>, vector<1x8x32xf32>
      %104 = vector.shape_cast %103 : vector<1x8x32xf32> to vector<8x32xf32>
      %105 = vector.shape_cast %102 : vector<8x32xf32> to vector<1x8x32xf32>
      tpu.vector_store %arg11[%c0_75, %c0_76, %c0_77], %105 {strides = array<i32>} : memref<1x8x32xf32, #tpu.memory_space<vmem>>, vector<1x8x32xf32>,
    } else {
    }
    %3 = arith.index_cast %arg1 : i32 to index
    %c0 = arith.constant 0 : index
    %c0_1 = arith.constant 0 : index
    %4 = vector.load %arg13[%3, %c0, %c0_1] : memref<4x8x8xf32, #tpu.memory_space<vmem>>, vector<1x8x8xf32>
    %5 = vector.shape_cast %4 : vector<1x8x8xf32> to vector<8x8xf32>
    %6 = arith.index_cast %arg1 : i32 to index
    %c0_2 = arith.constant 0 : index
    %c0_3 = arith.constant 0 : index
    %7 = vector.load %arg14[%6, %c0_2, %c0_3] : memref<4x8x8xf32, #tpu.memory_space<vmem>>, vector<1x8x8xf32>
    %8 = vector.shape_cast %7 : vector<1x8x8xf32> to vector<8x8xf32>
    %9 = arith.index_cast %arg1 : i32 to index
    %c0_4 = arith.constant 0 : index
    %c0_5 = arith.constant 0 : index
    %10 = vector.load %arg15[%9, %c0_4, %c0_5] : memref<4x8x8xf32, #tpu.memory_space<vmem>>, vector<1x8x8xf32>
    %11 = vector.shape_cast %10 : vector<1x8x8xf32> to vector<8x8xf32>
    %cst = arith.constant dense<0.000000e+00> : vector<8x8xf32>
    %12 = tpu.matmul %5, %8, %cst {dimension_numbers = #tpu.dot_dimension_numbers<[1], [1], [0], [0], [0, 0, 1, 0], [], []>} : vector<8x8xf32>, vector<8x8xf32>, vector<8x8xf32> -> vector<8x8xf32>
    %c0_6 = arith.constant 0 : index
    %c0_7 = arith.constant 0 : index
    %c0_8 = arith.constant 0 : index
    %c0_9 = arith.constant 0 : index
    %13 = vector.load %arg12[%c0_6, %c0_7, %c0_8, %c0_9] : memref<1x1x8x8xf32, #tpu.memory_space<vmem>>, vector<1x1x8x8xf32>
    %14 = vector.shape_cast %13 : vector<1x1x8x8xf32> to vector<8x8xf32>
    %15 = vector.shape_cast %12 : vector<8x8xf32> to vector<1x1x8x8xf32>
    tpu.vector_store %arg12[%c0_6, %c0_7, %c0_8, %c0_9], %15 {strides = array<i32>} : memref<1x1x8x8xf32, #tpu.memory_space<vmem>>, vector<1x1x8x8xf32>,
    %cst_10 = arith.constant dense<0xFF800000> : vector<8xf32>
    %16 = vector.multi_reduction <maximumf>, %12, %cst_10 [1] : vector<8x8xf32> to vector<8xf32>
    %17 = vector.shape_cast %16 : vector<8xf32> to vector<8x1xf32>
    %18 = vector.broadcast %17 : vector<8x1xf32> to vector<8x8xf32>
    %19 = arith.subf %12, %18 : vector<8x8xf32>
    %20 = math.exp %19 : vector<8x8xf32>
    %cst_11 = arith.constant dense<0.000000e+00> : vector<8xf32>
    %21 = vector.multi_reduction <add>, %20, %cst_11 [1] : vector<8x8xf32> to vector<8xf32>
    %22 = vector.shape_cast %21 : vector<8xf32> to vector<8x1xf32>
    %23 = tpu.reciprocal %22 {approx = true} : vector<8x1xf32> -> vector<8x1xf32>
    %24 = vector.broadcast %23 : vector<8x1xf32> to vector<8x8xf32>
    %25 = arith.mulf %20, %24 : vector<8x8xf32>
    %cst_12 = arith.constant dense<0.000000e+00> : vector<8x8xf32>
    %26 = tpu.matmul %25, %11, %cst_12 {dimension_numbers = #tpu.dot_dimension_numbers<[1], [0], [0], [1], [0, 0, 1, 1], [], []>} : vector<8x8xf32>, vector<8x8xf32>, vector<8x8xf32> -> vector<8x8xf32>
    %c0_13 = arith.constant 0 : index
    %c0_14 = arith.constant 0 : index
    %c0_15 = arith.constant 0 : index
    %27 = vector.load %arg11[%c0_13, %c0_14, %c0_15] : memref<1x8x32xf32, #tpu.memory_space<vmem>>, vector<1x8x32xf32>
    %28 = vector.shape_cast %27 : vector<1x8x32xf32> to vector<8x32xf32>
    %c0_16 = arith.constant 0 : index
    %c0_17 = arith.constant 0 : index
    %29 = vector.load %arg9[%c0_16, %c0_17] : memref<8x32xf32, #tpu.memory_space<vmem>>, vector<8x32xf32>
    %cst_18 = arith.constant dense<0.000000e+00> : vector<8x32xf32>
    %30 = tpu.matmul %26, %29, %cst_18 {dimension_numbers = #tpu.dot_dimension_numbers<[1], [0], [0], [1], [0, 0, 1, 1], [], []>} : vector<8x8xf32>, vector<8x32xf32>, vector<8x32xf32> -> vector<8x32xf32>
    %31 = arith.addf %28, %30 : vector<8x32xf32>
    %c0_19 = arith.constant 0 : index
    %c0_20 = arith.constant 0 : index
    %c0_21 = arith.constant 0 : index
    %32 = vector.load %arg11[%c0_19, %c0_20, %c0_21] : memref<1x8x32xf32, #tpu.memory_space<vmem>>, vector<1x8x32xf32>
    %33 = vector.shape_cast %32 : vector<1x8x32xf32> to vector<8x32xf32>
    %34 = vector.shape_cast %31 : vector<8x32xf32> to vector<1x8x32xf32>
    tpu.vector_store %arg11[%c0_19, %c0_20, %c0_21], %34 {strides = array<i32>} : memref<1x8x32xf32, #tpu.memory_space<vmem>>, vector<1x8x32xf32>,
    return
  }
  func.func @transform_0(%arg0: i32, %arg1: i32) -> (i32, i32, i32) {
    %c0_i32 = arith.constant 0 : i32
    %c0_i32_0 = arith.constant 0 : i32
    %c0_i32_1 = arith.constant 0 : i32
    return %arg0, %c0_i32, %c0_i32_0 : i32, i32, i32
  }
  func.func @transform_1(%arg0: i32, %arg1: i32) -> (i32, i32) {
    %c0_i32 = arith.constant 0 : i32
    %c0_i32_0 = arith.constant 0 : i32
    %c0_i32_1 = arith.constant 0 : i32
    return %c0_i32, %c0_i32_0 : i32, i32
  }
  func.func @transform_2(%arg0: i32, %arg1: i32) -> (i32, i32) {
    %c0_i32 = arith.constant 0 : i32
    %c0_i32_0 = arith.constant 0 : i32
    %c0_i32_1 = arith.constant 0 : i32
    return %c0_i32, %c0_i32_0 : i32, i32
  }
  func.func @transform_3(%arg0: i32, %arg1: i32) -> (i32, i32) {
    %c0_i32 = arith.constant 0 : i32
    %c0_i32_0 = arith.constant 0 : i32
    %c0_i32_1 = arith.constant 0 : i32
    return %c0_i32, %c0_i32_0 : i32, i32
  }
  func.func @transform_4(%arg0: i32, %arg1: i32) -> (i32, i32) {
    %c0_i32 = arith.constant 0 : i32
    %c0_i32_0 = arith.constant 0 : i32
    %c0_i32_1 = arith.constant 0 : i32
    return %c0_i32, %c0_i32_0 : i32, i32
  }
  func.func @transform_5(%arg0: i32, %arg1: i32) -> (i32, i32) {
    %c0_i32 = arith.constant 0 : i32
    %c0_i32_0 = arith.constant 0 : i32
    %c0_i32_1 = arith.constant 0 : i32
    return %c0_i32, %c0_i32_0 : i32, i32
  }
  func.func @transform_6(%arg0: i32, %arg1: i32) -> (i32, i32) {
    %c0_i32 = arith.constant 0 : i32
    %c0_i32_0 = arith.constant 0 : i32
    %c0_i32_1 = arith.constant 0 : i32
    return %c0_i32, %c0_i32_0 : i32, i32
  }
  func.func @transform_7(%arg0: i32, %arg1: i32) -> (i32, i32) {
    %c0_i32 = arith.constant 0 : i32
    %c0_i32_0 = arith.constant 0 : i32
    return %arg1, %c0_i32 : i32, i32
  }
  func.func @transform_8(%arg0: i32, %arg1: i32) -> (i32, i32) {
    %c0_i32 = arith.constant 0 : i32
    %c0_i32_0 = arith.constant 0 : i32
    %c0_i32_1 = arith.constant 0 : i32
    return %c0_i32, %c0_i32_0 : i32, i32
  }
  func.func @transform_9(%arg0: i32, %arg1: i32) -> (i32, i32, i32) {
    %c0_i32 = arith.constant 0 : i32
    %c0_i32_0 = arith.constant 0 : i32
    %c0_i32_1 = arith.constant 0 : i32
    return %arg0, %c0_i32, %c0_i32_0 : i32, i32, i32
  }
  func.func @transform_10(%arg0: i32, %arg1: i32) -> (i32, i32, i32, i32) {
    %c0_i32 = arith.constant 0 : i32
    %c0_i32_0 = arith.constant 0 : i32
    %c0_i32_1 = arith.constant 0 : i32
    return %arg1, %arg0, %c0_i32, %c0_i32_0 : i32, i32, i32, i32
  }
}

</mosaic_0001>

<bundles_post_ra>
// kernel: tpu_custom_call.1
= control target key start
LH: loop header
LB: loop body
LE: loop exit
PB: predicated region body
PF: predicated region fallthrough
CT: control target
= control target key end

     0   :  { %s2490_s0 = inlined_call_operand.hbm [shape: f32[2,8,32], index: 0, kind: input, shape index: {}]   ;;  %s2491_s1 = inlined_call_operand.hbm [shape: f32[32,32], index: 1, kind: input, shape index: {}]   ;;  %s2492_s2 = inlined_call_operand.vmem [shape: f32[1,32], index: 2, kind: input, shape index: {}]   ;;  %s2493_s3 = inlined_call_operand.hbm [shape: f32[32,32], index: 3, kind: input, shape index: {}]   ;;  %s2494_s4 = inlined_call_operand.vmem [shape: f32[1,32], index: 4, kind: input, shape index: {}]   ;;  %s2495_s5 = inlined_call_operand.hbm [shape: f32[32,32], index: 5, kind: input, shape index: {}]   ;;  %s2496_s6 = inlined_call_operand.vmem [shape: f32[1,32], index: 6, kind: input, shape index: {}]   ;;  %s2497_s7 = inlined_call_operand.hbm [shape: f32[32,32], index: 7, kind: input, shape index: {}]   ;;  %s2498_s8 = inlined_call_operand.vmem [shape: f32[1,32], index: 8, kind: input, shape index: {}]   ;;  %s2499_s9 = inlined_call_operand.hbm [shape: f32[2,8,32], index: 9, kind: output, shape index: {0}]   ;;  %s2500_s10 = inlined_call_operand.hbm [shape: f32[4,2,8,8], index: 10, kind: output, shape index: {1}]  }
   0x1   :  { %2531 = sst [smem:[#allocation34_spill]] %s2490_s0 }
   0x2   :  { %2532 = sst [smem:[#allocation35_spill]] %s2491_s1 }
   0x3   :  { %2533 = sst [smem:[#allocation36_spill]] %s2492_s2 }
   0x4   :  { %2534 = sst [smem:[#allocation37_spill]] %s2493_s3 }
   0x5   :  { %2535 = sst [smem:[#allocation38_spill]] %s2494_s4 }
   0x6   :  { %2536 = sst [smem:[#allocation39_spill]] %s2495_s5 }
   0x7   :  { %2537 = sst [smem:[#allocation40_spill]] %s2496_s6 }
   0x8   :  { %2538 = sst [smem:[#allocation41_spill]] %s2497_s7 }
   0x9   :  { %2539 = sst [smem:[#allocation42_spill]] %s2498_s8 }
   0xa   :  { %2540 = sst [smem:[#allocation43_spill]] %s2499_s9 }
   0xb   :  { %2541 = sst [smem:[#allocation44_spill]] %s2500_s10 }
   0xc   :  { %16 = vsyncpa [#allocation6], 0 }
   0xd   :  { %18 = vsyncpa [#allocation6 + $0x1], 0 }
   0xe   :  { %19 = vsyncpa [#allocation9], 0 }
   0xf   :  { %20 = vsyncpa [#allocation12], 0 }
  0x10   :  { %21 = vsyncpa [#allocation7], 0 }
  0x11   :  { %23 = vsyncpa [#allocation7 + $0x1], 0 }
  0x12   :  { %24 = vsyncpa [#allocation16], 0 }
  0x13   :  { %26 = vsyncpa [#allocation16 + $0x1], 0  ;;  %s1956_s13 = smov 0   ;;  %s1958_s14 = smov 0  }
  0x14   :  { %s1960_s15 = smov 0   ;;  %s1962_s16 = smov 0  }
  0x15   :  { %s1964_s17 = smov 0   ;;  %s1966_s18 = smov 0  }
  0x16   :  { %s1968_s19 = smov 0   ;;  %s1970_s20 = smov 0  }
  0x17   :  { %s1972_s21 = smov 0   ;;  %s1974_s22 = smov 0  }
  0x18   :  { %s1976_s23 = smov 0   ;;  %s1978_s24 = smov 0  }
  0x19   :  { %s1980_s25 = smov 0   ;;  %s1982_s26 = smov 0  }
  0x1a LB: > { %2542 = sst [smem:[#allocation23_spill]] %s1830_s13  ;;  %s2027_s27 = sadd.s32 4294967295, %s1882_s26   ;;  %s1882_s26 = sphi %s1982_s26, %s32_s26   ;;  %s1878_s25 = sphi %s1980_s25, %s2624_s25   ;;  %s1874_s24 = sphi %s1978_s24, %s2623_s24   ;;  %s1870_s23 = sphi %s1976_s23, %s2622_s23   ;;  %s1866_s22 = sphi %s1974_s22, %s2621_s22   ;;  %s1862_s21 = sphi %s1972_s21, %s2620_s21   ;;  %s1858_s20 = sphi %s1970_s20, %s2619_s20   ;;  %s1854_s19 = sphi %s1968_s19, %s2618_s19   ;;  %s1850_s18 = sphi %s1966_s18, %s2617_s18   ;;  %s1846_s17 = sphi %s1964_s17, %s2616_s17   ;;  %s1842_s16 = sphi %s1962_s16, %s2615_s16   ;;  %s1838_s15 = sphi %s1960_s15, %s2614_s15   ;;  %s1834_s14 = sphi %s1958_s14, %s2613_s14   ;;  %s1830_s13 = sphi %s1956_s13, %s2609_s13  }
  0x1b   : > { %2543 = sst [smem:[#allocation24_spill]] %s1834_s14  ;;  %p1243_p0 = scmp.ge.s32.totalorder %s1882_s26, 1 }
  0x1c   : > { %2544 = sst [smem:[#allocation25_spill]] %s1854_s19  ;;  %p2504_p1 = scmp.eq.s32.totalorder %s2027_s27, 0 }
  0x1d   : > { %2545 = sst [smem:[#allocation26_spill]] %s1866_s22  ;;  %p302_p2 = scmp.lt.s32.totalorder %s1882_s26, 9 }
  0x1e   : > { %2546 = sst [smem:[#allocation27_spill]] %s1870_s23  ;;  %s1884_s29 = smov [#allocation8]  }
  0x1f   : > { %p2032_p3 = pnand %p1243_p0, %p302_p2  ;;  %s314_s30 = sshll.u32 %s1884_s29, 4  ;;  %s315_s30 = int_to_ptr.vmem [resolvable:$true] %s314_s30 }
  0x20   : > { %s2549_s1 = sld [smem:[#allocation35_spill]] }
  0x21   : > { %s2547_s28 = scalar_select %p2032_p3, 1, 0 }
  0x22   : > { %p1387_p4 = pneg %p2032_p3 }
  0x24   : > { %p2040_p5 = pnand %p1387_p4, %p2504_p1 }
  0x26   : > { %s2548_s11 = scalar_select %p2040_p5, 1, 0 }
  0x27   : > { %s1548_s10 = scalar_lea.hbm %s2549_s1, 512  ;;  %p2052_p7 = pneg %p2040_p5 }
  0x28   : > { %p1549_p6 = scmp.ne.s32.totalorder %s2549_s1, %s1548_s10  ;;  %p1555_p10 = scmp.lt.u32.totalorder %s1548_s10, %s2549_s1 }
  0x2a   : > { %p1551_p8 = pnand %p2052_p7, %p1549_p6 }
  0x2c   : > { %p1552_p9 = pneg %p1551_p8 }
  0x2e   : > { %p1557_p11 = pnand %p1555_p10, %p1552_p9 }
  0x30   : > { %1560 = shalt.err (!%p1557_p11)
}
  0x31   : > { %s1561_s9 = scalar_lea.vmem %s315_s30, 512  ;;  %p1569_p2 = scmp.lt.s32.totalorder %s315_s30, %s315_s30 }
  0x32   : > { %p1562_p12 = scmp.ne.s32.totalorder %s315_s30, %s1561_s9  ;;  %p1570_p4 = scmp.lt.s32.totalorder %s1561_s9, %s1561_s9 }
  0x34   : > { %p1564_p13 = pnand %p1562_p12, %p2052_p7  ;;  %p1571_p1 = por %p1570_p4, %p1569_p2 }
  0x36   : > { %p1565_p0 = pneg %p1564_p13 }
  0x38   : > { %p1572_p3 = pnand %p1571_p1, %p1565_p0 }
  0x3a   : > { %1575 = shalt.err (!%p1572_p3)
}
  0x3b   : > { %s2509_s6 = smov 128   ;;  %s2511_s2 = smov 8  }
  0x3c   : > { %1390 = dma.hbm_to_vmem [thread:$0]  (!%p2040_p5), %s2549_s1, 512, %s315_s30, [#allocation9], %s2509_s6, %s2509_s6, %s2511_s2  }
  0x3d   : > { %s1242_s23 = sadd.s32 4294967294, %s1882_s26   ;;  %p58_p1 = scmp.ne.s32.totalorder %s1862_s21, %s1858_s20 }
  0x3e   : > { %p2506_p3 = scmp.eq.s32.totalorder %s1882_s26, 0  ;;  %p64_p6 = scmp.ne.s32.totalorder %s1858_s20, %s1854_s19 }
  0x3f   : > { %p261_p8 = scmp.eq.s32.totalorder %s2027_s27, 7  ;;  %p267_p10 = scmp.eq.s32.totalorder %s1242_s23, 7 }
  0x40   : > { %p2082_p9 = por %p2506_p3, %p58_p1  ;;  %p2552_p11 = scmp.eq.s32.totalorder %s2027_s27, 0 }
  0x41   : > { %p2092_p13 = por %p261_p8, %p58_p1  ;;  %p2096_p0 = por %p267_p10, %p64_p6 }
  0x42   : > { %p2088_p12 = por %p2552_p11, %p64_p6  ;;  %p288_p2 = scmp.ne.s32.totalorder %s1838_s15, %s1834_s14 }
  0x43   : > { %s2554_s4 = scalar_select %p2092_p13, 1, 0 }
  0x44   : > { %s2553_s30 = scalar_select %p2088_p12, 1, 0 }
  0x45   : > { %2555 = sst [smem:[#allocation28_spill]] %s2554_s4  ;;  %p294_p4 = scmp.ne.s32.totalorder %s1834_s14, %s1830_s13 }
  0x46   : > { %s2556_s10 = scalar_select %p2096_p0, 1, 0 }
  0x47   : > { %p2524_p3 = scmp.lt.s32.totalorder %s1882_s26, 8  ;;  %p2105_p5 = por %p288_p2, %p261_p8 }
  0x48   : > { %2557 = sst [smem:[#allocation29_spill]] %s2556_s10  ;;  %s366_s23 = sand.u32 1, %s1882_s26  }
  0x49   : > { %s2558_s9 = scalar_select %p2105_p5, 1, 0 }
  0x4a   : > { %p2110_p11 = por %p294_p4, %p267_p10  ;;  %s368_s6 = sand.u32 1, %s1862_s21  }
  0x4b   : > { %2559 = sst [smem:[#allocation30_spill]] %s2558_s9  ;;  %s1249_s2 = sshll.u32 %s1878_s25, 7 }
  0x4c   : > { %s2560_s12 = scalar_select %p2110_p11, 1, 0 }
  0x4d   : > { %s1248_s1 = sshll.u32 %s368_s6, 3  ;;  %s2562_s0 = sld [smem:[#allocation34_spill]] }
  0x4e   : > { %2561 = sst [smem:[#allocation31_spill]] %s2560_s12  ;;  %p2125_p1 = pnand %p2524_p3, %p2082_p9 }
  0x4f   : > { %s370_s12 = scalar_lea.vmem [#allocation5], %s1248_s1  ;;  %s2131_s6 = scalar_lea.sflag [#allocation6], %s366_s23 }
  0x50   : > { %s377_s10 = sshll.u32 %s370_s12, 4  ;;  %p1578_p8 = pneg %p2125_p1  ;;  %s2129_s10 = int_to_ptr.vmem [resolvable:$true] %s377_s10 }
  0x53   : > { %s2119_s22 = scalar_lea.hbm %s2562_s0, %s1249_s2  ;;  %s1581_s4 = scalar_lea.hbm %s2562_s0, 256 }
  0x54   : > { %s1576_s19 = scalar_lea.hbm %s2119_s22, 128  ;;  %p1582_p9 = scmp.lt.u32.totalorder %s2119_s22, %s2562_s0 }
  0x55   : > { %p1577_p6 = scmp.ne.s32.totalorder %s2119_s22, %s1576_s19  ;;  %p1583_p4 = scmp.lt.u32.totalorder %s1581_s4, %s1576_s19 }
  0x56   : > { %p1585_p11 = scmp.lt.u32.totalorder %s1576_s19, %s2119_s22 }
  0x57   : > { %p1579_p10 = pnand %p1578_p8, %p1577_p6  ;;  %p1584_p3 = por %p1583_p4, %p1582_p9 }
  0x59   : > { %p1580_p2 = pneg %p1579_p10  ;;  %p1586_p0 = por %p1585_p11, %p1584_p3 }
  0x5b   : > { %p1587_p13 = pnand %p1586_p0, %p1580_p2 }
  0x5d   : > { %1590 = shalt.err (!%p1587_p13)
}
  0x5e   : > { %s1591_s1 = scalar_lea.vmem %s2129_s10, 128  ;;  %s1887_s12 = smov [#allocation5]  }
  0x5f   : > { %p1592_p6 = scmp.ne.s32.totalorder %s2129_s10, %s1591_s1  ;;  %s1596_s23 = sshll.u32 %s1887_s12, 4  ;;  %s1597_s23 = int_to_ptr.vmem [resolvable:$false] %s1596_s23 }
  0x60   : > { %s1598_s14 = scalar_lea.vmem %s1597_s23, 256  ;;  %p1599_p12 = scmp.lt.s32.totalorder %s2129_s10, %s1597_s23 }
  0x61   : > { %p1594_p10 = pnand %p1592_p6, %p1578_p8  ;;  %p1600_p9 = scmp.lt.s32.totalorder %s1598_s14, %s1591_s1 }
  0x63   : > { %p1595_p5 = pneg %p1594_p10  ;;  %p1601_p4 = por %p1600_p9, %p1599_p12 }
  0x65   : > { %p1602_p3 = pnand %p1601_p4, %p1595_p5 }
  0x67   : > { %1605 = shalt.err (!%p1602_p3)
}
  0x68   : > { %1400 = dma.hbm_to_vmem [thread:$0]  (!%p2125_p1), %s2119_s22, 128, %s2129_s10, %s2131_s6  }
  0x69   : > { %s1888_s9 = smov [#allocation10]   ;;  %s1889_s8 = smov [#allocation11]  }
  0x6a   : > { %s330_s19 = sshll.u32 %s1888_s9, 4  ;;  %s346_s2 = sshll.u32 %s1889_s8, 4  ;;  %s331_s19 = int_to_ptr.vmem [resolvable:$true] %s330_s19  ;;  %s347_s2 = int_to_ptr.vmem [resolvable:$true] %s346_s2 }
  0x6b   : > { %s2564_s3 = sld [smem:[#allocation37_spill]] }
  0x71   : > { %s1606_s23 = scalar_lea.hbm %s2564_s3, 512 }
  0x72   : > { %p1607_p5 = scmp.ne.s32.totalorder %s2564_s3, %s1606_s23  ;;  %p1613_p0 = scmp.lt.u32.totalorder %s1606_s23, %s2564_s3 }
  0x74   : > { %p1609_p12 = pnand %p1607_p5, %p2052_p7 }
  0x76   : > { %p1610_p13 = pneg %p1609_p12 }
  0x78   : > { %p1615_p11 = pnand %p1613_p0, %p1610_p13 }
  0x7a   : > { %1618 = shalt.err (!%p1615_p11)
}
  0x7b   : > { %s1619_s22 = scalar_lea.vmem %s331_s19, 512  ;;  %p1627_p6 = scmp.lt.s32.totalorder %s331_s19, %s331_s19 }
  0x7c   : > { %p1620_p1 = scmp.ne.s32.totalorder %s331_s19, %s1619_s22  ;;  %p1628_p10 = scmp.lt.s32.totalorder %s1619_s22, %s1619_s22 }
  0x7e   : > { %p1622_p8 = pnand %p1620_p1, %p2052_p7  ;;  %p1629_p9 = por %p1628_p10, %p1627_p6 }
  0x80   : > { %p1623_p2 = pneg %p1622_p8 }
  0x82   : > { %p1630_p4 = pnand %p1629_p9, %p1623_p2 }
  0x84   : > { %1633 = shalt.err (!%p1630_p4)
}
  0x85   : > { %p2565_p3 = scmp.ne.s32.totalorder %s2548_s11, 0  ;;  %s2566_s10 = smov 8  }
  0x86   : > { %s2567_s9 = smov 128   ;;  %s2568_s5 = sld [smem:[#allocation39_spill]] }
  0x87   : > { %1393 = dma.hbm_to_vmem [thread:$0]  (!%p2565_p3), %s2564_s3, 512, %s331_s19, [#allocation9], %s2567_s9, %s2567_s9, %s2566_s10  }
  0x8c   : > { %s1634_s23 = scalar_lea.hbm %s2568_s5, 512 }
  0x8d   : > { %p1635_p5 = scmp.ne.s32.totalorder %s2568_s5, %s1634_s23  ;;  %p1641_p0 = scmp.lt.u32.totalorder %s1634_s23, %s2568_s5 }
  0x8f   : > { %p1637_p12 = pnand %p1635_p5, %p2052_p7 }
  0x91   : > { %p1638_p13 = pneg %p1637_p12 }
  0x93   : > { %p1643_p11 = pnand %p1641_p0, %p1638_p13 }
  0x95   : > { %1646 = shalt.err (!%p1643_p11)
}
  0x96   : > { %s1647_s0 = scalar_lea.vmem %s347_s2, 512  ;;  %p1655_p6 = scmp.lt.s32.totalorder %s347_s2, %s347_s2 }
  0x97   : > { %p1648_p1 = scmp.ne.s32.totalorder %s347_s2, %s1647_s0  ;;  %p1656_p10 = scmp.lt.s32.totalorder %s1647_s0, %s1647_s0 }
  0x99   : > { %p1650_p8 = pnand %p1648_p1, %p2052_p7  ;;  %p1657_p9 = por %p1656_p10, %p1655_p6 }
  0x9b   : > { %p1651_p2 = pneg %p1650_p8 }
  0x9d   : > { %p1658_p4 = pnand %p1657_p9, %p1651_p2 }
  0x9f   : > { %1661 = shalt.err (!%p1658_p4)
}
  0xa0   : > { %1396 = dma.hbm_to_vmem [thread:$0]  (!%p2565_p3), %s2568_s5, 512, %s347_s2, [#allocation12], %s2567_s9, %s2567_s9, %s2566_s10  }
  0xa1   : > { %s41_s11 = sadd.s32 1, %s1874_s24  ;;  %s203_s29 = sadd.s32 1, %s1850_s18 }
  0xa2   : > { %p42_p7 = scmp.ge.s32.totalorder %s41_s11, 4  ;;  %p210_p5 = scmp.ne.s32.totalorder %s1850_s18, %s1846_s17 }
  0xa3   : > { %p216_p12 = scmp.ne.s32.totalorder %s1846_s17, %s1842_s16  ;;  %s2570_s4 = sadd.s32 1, %s1878_s25 }
  0xa4   : > { %s2626_s11 = smov (%p42_p7, %s41_s11), 0  ;;  %s2628_s4 = smov (!%p42_p7, %s2570_s4), %s1878_s25 }
  0xa5   : > { %2569 = sst [smem:[#allocation32_spill]] %s2626_s11  ;;  %s200_s12 = ssub.s32 %s1874_s24, %s2626_s11 }
  0xa6   : > { %p2571_p13 = scmp.eq.s32.totalorder %s1882_s26, 0  ;;  %p46_p3 = scmp.ge.s32.totalorder %s2628_s4, 2 }
  0xa7   : > { %p201_p11 = scmp.eq.s32.totalorder %s200_s12, 0  ;;  %p2573_p1 = scmp.eq.s32.totalorder %s2027_s27, 0 }
  0xa8   : > { %p2216_p0 = por %p210_p5, %p2571_p13  ;;  %s278_s10 = sadd.s32 1, %s1838_s15 }
  0xa9   : > { %p2222_p8 = por %p216_p12, %p2573_p1  ;;  %s2630_s4 = smov (%p46_p3, %s2628_s4), 0 }
  0xaa   : > { %2575 = sst [smem:[#allocation33_spill]] %s2630_s4  ;;  %s48_s23 = ssub.s32 %s1878_s25, %s2630_s4 }
  0xab   : > { %s2230_s9 = scalar_select %p201_p11, %s1850_s18, %s203_s29  }
  0xac   : > { %s386_s1 = sand.u32 1, %s1850_s18   ;;  %p49_p2 = scmp.eq.s32.totalorder %s48_s23, 0 }
  0xad   : > { %s275_s14 = sor.u32 %s200_s12, %s48_s23  ;;  %s1250_s13 = sshll.u32 %s386_s1, 3 }
  0xae   : > { %p276_p6 = scmp.eq.s32.totalorder %s275_s14, 0  ;;  %s2576_s22 = sadd.s32 1, %s1862_s21 }
  0xaf   : > { %s2238_s0 = scalar_select %p49_p2, %s1862_s21, %s2576_s22  }
  0xb0   : > { %s2241_s19 = scalar_select %p276_p6, %s1838_s15, %s278_s10  }
  0xb1   : > { %s1251_s8 = sshll.u32 %s1874_s24, 7  ;;  %s2577_s7 = sld [smem:[#allocation41_spill]] }
  0xb2   : > { %s388_s29 = scalar_lea.vmem [#allocation13], %s1250_s13  ;;  %p2578_p10 = scmp.lt.s32.totalorder %s1882_s26, 8 }
  0xb3   : > { %s395_s4 = sshll.u32 %s388_s29, 4  ;;  %s2249_s4 = int_to_ptr.vmem [resolvable:$true] %s395_s4 }
  0xb4   : > { %p2255_p9 = pnand %p2578_p10, %p2216_p0 }
  0xb6   : > { %p1664_p7 = pneg %p2255_p9 }
  0xb7   : > { %s2247_s11 = scalar_lea.hbm %s2577_s7, %s1251_s8  ;;  %s1667_s23 = scalar_lea.hbm %s2577_s7, 512 }
  0xb8   : > { %s1662_s10 = scalar_lea.hbm %s2247_s11, 128  ;;  %p1668_p13 = scmp.lt.u32.totalorder %s2247_s11, %s2577_s7 }
  0xb9   : > { %p1663_p4 = scmp.ne.s32.totalorder %s2247_s11, %s1662_s10  ;;  %p1669_p0 = scmp.lt.u32.totalorder %s1667_s23, %s1662_s10 }
  0xba   : > { %p1671_p11 = scmp.lt.u32.totalorder %s1662_s10, %s2247_s11 }
  0xbb   : > { %p1665_p5 = pnand %p1664_p7, %p1663_p4  ;;  %p1670_p3 = por %p1669_p0, %p1668_p13 }
  0xbd   : > { %p1666_p12 = pneg %p1665_p5  ;;  %p1672_p1 = por %p1671_p11, %p1670_p3 }
  0xbf   : > { %p1673_p2 = pnand %p1672_p1, %p1666_p12 }
  0xc1   : > { %1676 = shalt.err (!%p1673_p2)
}
  0xc2   : > { %s1677_s14 = scalar_lea.vmem %s2249_s4, 128  ;;  %s1890_s13 = smov [#allocation13]  }
  0xc3   : > { %p1678_p6 = scmp.ne.s32.totalorder %s2249_s4, %s1677_s14  ;;  %s1682_s22 = sshll.u32 %s1890_s13, 4  ;;  %s1683_s22 = int_to_ptr.vmem [resolvable:$false] %s1682_s22 }
  0xc4   : > { %s1684_s8 = scalar_lea.vmem %s1683_s22, 256  ;;  %p1685_p5 = scmp.lt.s32.totalorder %s2249_s4, %s1683_s22 }
  0xc5   : > { %p1680_p10 = pnand %p1678_p6, %p1664_p7  ;;  %p1686_p13 = scmp.lt.s32.totalorder %s1684_s8, %s1677_s14 }
  0xc7   : > { %p1681_p4 = pneg %p1680_p10  ;;  %p1687_p0 = por %p1686_p13, %p1685_p5 }
  0xc9   : > { %p1688_p3 = pnand %p1687_p0, %p1681_p4 }
  0xcb   : > { %1691 = shalt.err (!%p1688_p3)
}
  0xcc   : > { %1403 = dma.hbm_to_vmem [thread:$0]  (!%p2255_p9), %s2247_s11, 128, %s2249_s4, %s2131_s6  }
  0xcd   : > { %p2580_p12 = scmp.ne.s32.totalorder %s2547_s28, 0 }
  0xce   : > { %s406_s29 = sand.u32 (!%p2580_p12), 1, %s2027_s27   ;;  %s2530_s10 = sand.u32 (!%p2580_p12), 1, %s1858_s20  }
  0xcf   : > { %404 = sbr.rel (%p2580_p12) target bundleno = 1567 (0x61f), region = 56  ;;  %s2291_s3 = sshll.u32 (!%p2580_p12), %s2530_s10, 3 }
  0xd0   : > { %s407_s5 = scalar_lea.sflag (!%p2580_p12), [#allocation6], %s406_s29  ;;  %s410_s23 = scalar_lea.vmem (!%p2580_p12), [#allocation5], %s2291_s3 }
  0xd1   : > { %p2581_p7 = scmp.ne.s32.totalorder (!%p2580_p12), %s2553_s30, 0 }
  0xd6   : > { %1805 = dma.done.wait (%p2581_p7), %s407_s5, 128  }
  0xd7   : > { %1807 = vsyncadd (%p2581_p7), %s407_s5, 4294967168  ;;  %p2582_p9 = scmp.eq.s32.totalorder %s2027_s27, 0 }
  0xd9   : > { %1809 = dma.done.wait (%p2582_p9), [#allocation9], 1024   ;;  %p2583_p11 = pmov %p2582_p9 }
  0xda   : > { %p2584_p1 = pmov %p2582_p9 }
  0xdb   : > { %1811 = vsyncadd (%p2583_p11), [#allocation9], 4294966272 }
  0xdc   : > { %1813 = dma.done.wait (%p2584_p1), [#allocation12], 512   ;;  %p2585_p2 = pmov %p2584_p1 }
  0xdd   : > { %s429_s28 = sand.u32 1, %s1846_s17  }
  0xde   : > { %1815 = vsyncadd (%p2585_p2), [#allocation12], 4294966784  ;;  %s2307_s6 = sshll.u32 %s429_s28, 3 }
  0xdf   : > { %s431_s30 = scalar_lea.vmem [#allocation13], %s2307_s6 }
  0xe0   : > { %1817 = dma.done.wait (%p2222_p8), %s407_s5, 128  }
  0xe1   : > { %1819 = vsyncadd (%p2222_p8), %s407_s5, 4294967168  ;;  %s2586_s11 = sld [smem:[#allocation24_spill]]  ;;  %s2320_s27 = scalar_lea.vmem [#allocation14], %s2291_s3 }
  0xe2   : > { %s2587_s1 = sld [smem:[#allocation26_spill]] }
  0xe7   : > { %s475_s4 = sand.u32 1, %s2586_s11  }
  0xe8   : > { %s2317_s12 = sshll.u32 %s475_s4, 3  ;;  %p1260_p6 = scmp.ne.s32.totalorder %s2587_s1, 0 }
  0xe9   : > { %s477_s2 = scalar_lea.vmem [#allocation15], %s2317_s12  ;;  %v483_v0 = vld [vmem:[#allocation8] sm:$0xff] (!%p1260_p6)  ;;  %v484_v1 = vld [vmem:[#allocation8 + $0x8] sm:$0xff] (!%p1260_p6)  ;;  %v1891_v3 = vmov (!%p1260_p6), 0.0|0.0   ;;  %v485_v6 = vld [vmem:[#allocation8 + $0x10] sm:$0xff] (!%p1260_p6)  ;;  %vm1892_vm0 = vmmov (!%p1260_p6), 0  }
  0xea   : > { %481 = sbr.rel (%p1260_p6) target bundleno = 589 (0x24d), region = 80  ;;  %v568_v2 = vld [vmem:[#allocation10] sm:$0xff] (!%p1260_p6)  ;;  %1349 = vmatprep.subr.bf16.mxu0 (!%p1260_p6), %v1891_v3  ;;  %v1350_v4 = vpack.c.bf16 (!%p1260_p6), %v484_v1, %v483_v0  ;;  %1355 = vmatprep.subr.bf16.mxu1 (!%p1260_p6), %v1891_v3  ;;  %v569_v5 = vld [vmem:[#allocation10 + $0x8] sm:$0xff] (!%p1260_p6)  ;;  %v486_v7 = vld [vmem:[#allocation8 + $0x18] sm:$0xff] (!%p1260_p6)  ;;  %v1893_v9 = vmov (!%p1260_p6), 0.0   ;;  %vm494_vm1 = vcmask (!%p1260_p6), 261120  }
  0xeb   : > { %v1356_v8 = vpack.c.bf16 (!%p1260_p6), %v569_v5, %v568_v2  ;;  %1309 = vmatprep.mubr.msk.f32.mxu0 (!%p1260_p6), %vm1892_vm0, %v1893_v9  ;;  %s2588_s13 = sld [smem:[#allocation42_spill]] (!%p1260_p6)  ;;  %v570_v11 = vld [vmem:[#allocation10 + $0x10] sm:$0xff] (!%p1260_p6)  ;;  %1320 = vmatprep.mubr.msk.f32.mxu1 (!%p1260_p6), %vm1892_vm0, %v1893_v9  ;;  %v1353_v12 = vpack.c.bf16 (!%p1260_p6), %v486_v7, %v485_v6  ;;  %v571_v13 = vld [vmem:[#allocation10 + $0x18] sm:$0xff] (!%p1260_p6)  ;;  %v649_v15 = vld [vmem:[#allocation11] sm:$0xff] (!%p1260_p6)  ;;  %s2589_s29 = sld [smem:[#allocation36_spill]] (!%p1260_p6)  ;;  %vm730_vm2 = vcmask (!%p1260_p6), 64512  }
  0xec   : > { %1351 = vmatpush3.bf16.msra.mxu0 (!%p1260_p6), %v1350_v4  ;;  %v1359_v14 = vpack.c.bf16 (!%p1260_p6), %v571_v13, %v570_v11  ;;  %v650_v16 = vld [vmem:[#allocation11 + $0x8] sm:$0xff] (!%p1260_p6)  ;;  %v482_v17 = vld [vmem:[%s410_s23] sm:$0xff] (!%p1260_p6)  ;;  %s2590_s23 = sld [smem:[#allocation38_spill]] (!%p1260_p6)  ;;  %s1894_s28 = smov (!%p1260_p6), 112  }
  0xed   : > { %1352 = vmatprep.subr.bf16.mxu0 (!%p1260_p6), %v1891_v3  ;;  %1357 = vmatpush3.bf16.msra.mxu1 (!%p1260_p6), %v1356_v8  ;;  %v1362_v18 = vpack.c.bf16 (!%p1260_p6), %v650_v16, %v649_v15  ;;  %v651_v19 = vld [vmem:[#allocation11 + $0x10] sm:$0xff] (!%p1260_p6)  ;;  %v652_v20 = vld [vmem:[#allocation11 + $0x18] sm:$0xff] (!%p1260_p6)  ;;  %s1895_s11 = smov (!%p1260_p6), 120   ;;  %s2591_s14 = sld [smem:[#allocation40_spill]] (!%p1260_p6) }
  0xee   : > { %1358 = vmatprep.subr.bf16.mxu1 (!%p1260_p6), %v1891_v3  ;;  %v1365_v21 = vpack.c.bf16 (!%p1260_p6), %v652_v20, %v651_v19 }
  0xf0   : > { %1354 = vmatpush3.bf16.msra.mxu0 (!%p1260_p6), %v1353_v12 }
  0xf1   : > { %v1267_v10 = vld [vmem:[%s2588_s13] ss:$0 sm:$0xff]  ;;  %1360 = vmatpush3.bf16.msra.mxu1 %v1359_v14  ;;  %1361 = vmatprep.subr.bf16.mxu0 %v1891_v3  ;;  %s1896_s13 = smov 104  }
  0xf2   : > { %789 = vst.msk [vmem:[%s2320_s27] sm:$0xff] %vm494_vm1, %v1267_v10  ;;  %v1261_v22 = vld [vmem:[%s2589_s29] ss:$0 sm:$0xff] }
  0xf3   : > { %1310 = vmatmul.mubr.msk.f32.vlgmr.msra.gmra.mrb[0].mxu0 %vm494_vm1, %v482_v17  ;;  %v1263_v23 = vld [vmem:[%s2590_s23] ss:$0 sm:$0xff] }
  0xf4   : > { %1363 = vmatpush3.bf16.msra.mxu0 %v1362_v18  ;;  %1321 = vmatmul.mubr.msk.f32.vlgmr.msra.gmra.mrb[0].mxu1 %vm494_vm1, %v482_v17  ;;  %v1265_v30 = vld [vmem:[%s2591_s14] ss:$0 sm:$0xff] }
  0xf5   : > { %1364 = vmatprep.subr.bf16.mxu0 %v1891_v3  ;;  %1331 = vmatprep.mubr.msk.f32.mxu0 %vm1892_vm0, %v1893_v9 }
  0xf8   : > { %1366 = vmatpush3.bf16.msra.mxu0 %v1365_v21 }
  0xfb   : > { %1332 = vmatmul.mubr.msk.f32.vlgmr.msra.gmra.mrb[2].mxu0 %vm494_vm1, %v482_v17 }
 0x1c6   : > { %v564_v24 = vpop.f32.mrb[0].mxu0 }
 0x1c7   : > { %v565_v25 = vadd.f32 %v1261_v22, %v564_v24  ;;  %v1311_v26 = vpop.f32.mrb[1].mxu0  ;;  %v645_v27 = vpop.f32.mrb[0].mxu1 }
 0x1c8   : > { %v646_v28 = vadd.f32 %v1263_v23, %v645_v27  ;;  %v1322_v29 = vpop.f32.mrb[1].mxu1 }
 0x1c9   : > { %731 = vst.msk [vmem:[#allocation2] sm:$0xff] %vm730_vm2, %v565_v25  ;;  %752 = vrot.lane.b32.xlu1 %v565_v25, %s1894_s28  ;;  %735 = vrot.lane.b32.xlu0 %v565_v25, %s1895_s11 }
 0x1ca   : > { %732 = vst.msk [vmem:[#allocation3] sm:$0xff] %vm730_vm2, %v646_v28 }
 0x1cd   : > { %741 = vrot.lane.b32.xlu0 %v646_v28, %s1895_s11 }
 0x1ce   : > { %v726_v31 = vpop.f32.mrb[2].mxu0 }
 0x1cf   : > { %v727_v32 = vadd.f32 %v1265_v30, %v726_v31  ;;  %v1333_v33 = vpop.f32.mrb[3].mxu0 }
 0x1d1   : > { %733 = vst.msk [vmem:[#allocation4] sm:$0xff] %vm730_vm2, %v727_v32  ;;  %757 = vrot.lane.b32.xlu0 %v646_v28, %s1894_s28  ;;  %747 = vrot.lane.b32.xlu1 %v727_v32, %s1895_s11 }
 0x1d5   : > { %767 = vrot.lane.b32.xlu0 %v565_v25, %s1896_s13  ;;  %762 = vrot.lane.b32.xlu1 %v727_v32, %s1894_s28 }
 0x1d9   : > { %777 = vrot.lane.b32.xlu0 %v727_v32, %s1896_s13  ;;  %772 = vrot.lane.b32.xlu1 %v646_v28, %s1896_s13 }
 0x23b   : > { %v753_v34 = vpop.permute.xlu1 %752  ;;  %v736_v35 = vpop.permute.xlu0 %735 }
 0x23c   : > { %756 = vst.msk [vmem:[#allocation2 + $0x10] sm:$0xff] %vm730_vm2, %v753_v34  ;;  %739 = vst.msk [vmem:[#allocation2 + $0x8] sm:$0xff] %vm730_vm2, %v736_v35 }
 0x23f   : > { %v742_v36 = vpop.permute.xlu0 %741 }
 0x240   : > { %745 = vst.msk [vmem:[#allocation3 + $0x8] sm:$0xff] %vm730_vm2, %v742_v36 }
 0x243   : > { %v758_v37 = vpop.permute.xlu0 %757  ;;  %v748_v38 = vpop.permute.xlu1 %747 }
 0x244   : > { %761 = vst.msk [vmem:[#allocation3 + $0x10] sm:$0xff] %vm730_vm2, %v758_v37  ;;  %751 = vst.msk [vmem:[#allocation4 + $0x8] sm:$0xff] %vm730_vm2, %v748_v38 }
 0x247   : > { %v768_v39 = vpop.permute.xlu0 %767  ;;  %v763_v40 = vpop.permute.xlu1 %762 }
 0x248   : > { %771 = vst.msk [vmem:[#allocation2 + $0x18] sm:$0xff] %vm730_vm2, %v768_v39  ;;  %766 = vst.msk [vmem:[#allocation4 + $0x10] sm:$0xff] %vm730_vm2, %v763_v40 }
 0x24b   : > { %v778_v41 = vpop.permute.xlu0 %777  ;;  %v773_v42 = vpop.permute.xlu1 %772 }
 0x24c   : > { %781 = vst.msk [vmem:[#allocation4 + $0x18] sm:$0xff] %vm730_vm2, %v778_v41  ;;  %776 = vst.msk [vmem:[#allocation3 + $0x18] sm:$0xff] %vm730_vm2, %v773_v42 }
 0x24d PF: > { %s2592_s22 = sld [smem:[#allocation26_spill]]  ;;  %vm797_vm3 = vcmask 64512   ;;  %v1897_v43 = vmov 0.0   ;;  %vm1898_vm4 = vmmov 0   ;;  %s2593_s23 = sld [smem:[#allocation27_spill]]  ;;  %v960_v58 = vld [vmem:[%s431_s30] sm:$0xff] }
 0x24e   : > { %1334 = vmatprep.subr.mxu0 %v1897_v43  ;;  %1336 = vmatprep.mubr.msk.f32.mxu0 %vm1898_vm4, %v1897_v43  ;;  %s2595_s11 = sld [smem:[#allocation30_spill]]  ;;  %s1071_s13 = sshll.u32 %s477_s2, 4  ;;  %s1072_s13 = int_to_ptr.vmem [resolvable:$true] %s1071_s13 }
 0x24f   : > { %1339 = vmatprep.subr.mxu1 %v1897_v43  ;;  %1341 = vmatprep.mubr.msk.f32.mxu1 %vm1898_vm4, %v1897_v43  ;;  %s1043_s30 = scalar_lea.sflag [#allocation16], %s475_s4  ;;  %s1899_s10 = smov [#allocation15]  }
 0x250   : > { %s1696_s7 = sshll.u32 %s1899_s10, 4  ;;  %s1697_s7 = int_to_ptr.vmem [resolvable:$false] %s1696_s7 }
 0x251   : > { %p1699_p13 = scmp.lt.s32.totalorder %s1072_s13, %s1697_s7 }
 0x253   : > { %s1268_s8 = sshll.u32 %s2592_s22, 3  ;;  %s1276_s1 = sshll.u32 %s2592_s22, 1 }
 0x254   : > { %s793_s29 = scalar_lea.vmem [#allocation3], %s1268_s8  ;;  %s791_s3 = scalar_lea.vmem [#allocation2], %s1268_s8 }
 0x255   : > { %v794_v44 = vld [vmem:[%s793_s29] sm:$0xff]  ;;  %s795_s5 = scalar_lea.vmem [#allocation4], %s1268_s8  ;;  %s1067_s16 = sadd.s32 %s2593_s23, %s1276_s1 }
 0x256   : > { %1335 = vmatpush3.xpose.msk.msra.mxu0 %vm797_vm3, %v794_v44  ;;  %v792_v45 = vld [vmem:[%s791_s3] sm:$0xff]  ;;  %s1277_s14 = sshll.u32 %s1067_s16, 7  ;;  %s2596_s3 = sld [smem:[#allocation44_spill]] }
 0x257   : > { %v796_v54 = vld [vmem:[%s795_s5] sm:$0xff]  ;;  %s1692_s5 = scalar_lea.vmem %s1072_s13, 128  ;;  %p2597_p10 = scmp.ne.s32.totalorder %s2595_s11, 0 }
 0x258   : > { %1340 = vmatpush3.msra.mxu1 %v796_v54  ;;  %p1693_p8 = scmp.ne.s32.totalorder %s1072_s13, %s1692_s5  ;;  %s1698_s22 = scalar_lea.vmem %s1697_s7, 256 }
 0x259   : > { %1337 = vmatmul.mubr.msk.f32.vlgmr.msra.gmra.mrb[0].mxu0 %vm797_vm3, %v792_v45  ;;  %1344 = vmatprep.subr.mxu1 %v1897_v43  ;;  %p1700_p0 = scmp.lt.s32.totalorder %s1698_s22, %s1692_s5 }
 0x25a   : > { %p1694_p4 = pnand %p1693_p8, %p2597_p10 }
 0x25b   : > { %p1701_p3 = por %p1700_p0, %p1699_p13 }
 0x25c   : > { %s2380_s6 = scalar_lea.hbm %s2596_s3, %s1277_s14  ;;  %p1695_p5 = pneg %p1694_p4 }
 0x25e   : > { %p1702_p12 = pnand %p1701_p3, %p1695_p5 }
 0x32c   : > { %v870_v46 = vpop.f32.mrb[0].mxu0 }
 0x32d   : > { %874 = vst.msk [vmem:[%s477_s2] sm:$0xff] %vm797_vm3, %v870_v46  ;;  %v1338_v47 = vpop.f32.mrb[1].mxu0  ;;  %v875_v48 = vsel %vm797_vm3, %v870_v46, -inf }
 0x32e   : > { %876 = vmax.xlane.f32.xlu0 %v875_v48 }
 0x3bb   : > { %v877_v49 = vpop.xlane.xlu0 %876 }
 0x3bc   : > { %v878_v50 = vsub.f32 %v870_v46, %v877_v49 }
 0x3be   : > { %v879_v51 = vmul.f32 1.442695, %v878_v50 }
 0x3c0   : > { %1544 = vpow2.f32 %v879_v51 }
 0x3ca   : > { %v1545_v52 = vpop.eup %1544 }
 0x3cb   : > { %v881_v53 = vsel %vm797_vm3, %v1545_v52, 0.0 }
 0x3cc   : > { %882 = vadd.xlane.f32.xlu0 %v881_v53 }
 0x459   : > { %v883_v55 = vpop.xlane.xlu0 %882 }
 0x45a   : > { %1546 = vrcp.f32 %v883_v55 }
 0x464   : > { %v1547_v56 = vpop.eup %1546 }
 0x465   : > { %v885_v57 = vmul.f32 %v1547_v56, %v1545_v52 }
 0x467   : > { %1342 = vmatmul.mubr.msk.f32.vlgmr.msra.gmra.mrb[0].mxu1 %vm797_vm3, %v885_v57 }
 0x468   : > { %1345 = vmatpush3.msra.mxu1 %v960_v58  ;;  %1346 = vmatprep.mubr.msk.f32.mxu1 %vm1898_vm4, %v1897_v43 }
 0x53a   : > { %v955_v59 = vpop.f32.mrb[0].mxu1 }
 0x53b   : > { %v1343_v60 = vpop.f32.mrb[1].mxu1  ;;  %1347 = vmatmul.mubr.msk.f32.vlgmr.msra.gmra.mrb[2].mxu1 %vm797_vm3, %v955_v59 }
 0x53c   : > { %1705 = shalt.err (!%p1702_p12)
}
 0x53d   : > { %s1706_s4 = scalar_lea.hbm %s2380_s6, 128  ;;  %s1710_s10 = scalar_lea.hbm %s2596_s3, 1024 }
 0x53e   : > { %p1707_p7 = scmp.ne.s32.totalorder %s2380_s6, %s1706_s4  ;;  %p1711_p1 = scmp.lt.u32.totalorder %s2380_s6, %s2596_s3 }
 0x53f   : > { %p1712_p2 = scmp.lt.u32.totalorder %s1710_s10, %s1706_s4  ;;  %p1714_p8 = scmp.lt.u32.totalorder %s1706_s4, %s2380_s6 }
 0x540   : > { %p1708_p9 = pnand %p1707_p7, %p2597_p10 }
 0x541   : > { %p1713_p6 = por %p1712_p2, %p1711_p1 }
 0x542   : > { %p1709_p11 = pneg %p1708_p9 }
 0x543   : > { %p1715_p4 = por %p1714_p8, %p1713_p6 }
 0x545   : > { %p1716_p5 = pnand %p1715_p4, %p1709_p11 }
 0x547   : > { %1719 = shalt.err (!%p1716_p5)
}
 0x548   : > { %s2598_s1 = sld [smem:[#allocation28_spill]]  ;;  %v959_v61 = vld [vmem:[%s2320_s27] sm:$0xff]  ;;  %s1275_s16 = sshll.u32 %s2593_s23, 7  ;;  %vm1035_vm5 = vcmask 261120  }
 0x549   : > { %1384 = dma.vmem_to_hbm [thread:$0]  (%p2597_p10), %s1072_s13, 128, %s2380_s6, %s1043_s30  }
 0x54a   : > { %s1056_s14 = sshll.u32 %s2320_s27, 4  ;;  %s2599_s5 = sld [smem:[#allocation43_spill]]  ;;  %s2409_s14 = int_to_ptr.vmem [resolvable:$true] %s1056_s14 }
 0x54b   : > { %s2600_s11 = sand.u32 1, %s1858_s20   ;;  %s1720_s6 = scalar_lea.vmem %s2409_s14, 128 }
 0x54c   : > { %s1038_s13 = scalar_lea.sflag [#allocation7], %s2600_s11  ;;  %p1721_p10 = scmp.ne.s32.totalorder %s2409_s14, %s1720_s6 }
 0x54d   : > { %s1900_s23 = smov [#allocation14]  }
 0x54e   : > { %p2601_p13 = scmp.ne.s32.totalorder %s2598_s1, 0  ;;  %s1724_s30 = sshll.u32 %s1900_s23, 4  ;;  %s1725_s30 = int_to_ptr.vmem [resolvable:$false] %s1724_s30 }
 0x54f   : > { %s1726_s4 = scalar_lea.vmem %s1725_s30, 256  ;;  %p1727_p12 = scmp.lt.s32.totalorder %s2409_s14, %s1725_s30 }
 0x550   : > { %s2407_s22 = scalar_lea.hbm %s2599_s5, %s1275_s16  ;;  %p1722_p0 = pnand %p1721_p10, %p2601_p13 }
 0x551   : > { %p1728_p7 = scmp.lt.s32.totalorder %s1726_s4, %s1720_s6 }
 0x552   : > { %p1723_p3 = pneg %p1722_p0 }
 0x553   : > { %p1729_p9 = por %p1728_p7, %p1727_p12 }
 0x555   : > { %p1730_p11 = pnand %p1729_p9, %p1723_p3 }
 0x60e   : > { %v1030_v62 = vpop.f32.mrb[2].mxu1 }
 0x60f   : > { %v1034_v63 = vadd.f32 %v1030_v62, %v959_v61  ;;  %v1348_v0 = vpop.f32.mrb[3].mxu1 }
 0x611   : > { %1036 = vst.msk [vmem:[%s2320_s27] sm:$0xff] %vm1035_vm5, %v1034_v63 }
 0x612   : > { %1733 = shalt.err (!%p1730_p11)
}
 0x613   : > { %s1734_s27 = scalar_lea.hbm %s2407_s22, 128  ;;  %s1738_s10 = scalar_lea.hbm %s2599_s5, 256 }
 0x614   : > { %p1735_p1 = scmp.ne.s32.totalorder %s2407_s22, %s1734_s27  ;;  %p1739_p8 = scmp.lt.u32.totalorder %s2407_s22, %s2599_s5 }
 0x615   : > { %p1740_p4 = scmp.lt.u32.totalorder %s1738_s10, %s1734_s27  ;;  %p1742_p10 = scmp.lt.u32.totalorder %s1734_s27, %s2407_s22 }
 0x616   : > { %p1736_p2 = pnand %p1735_p1, %p2601_p13 }
 0x617   : > { %p1741_p5 = por %p1740_p4, %p1739_p8 }
 0x618   : > { %p1737_p6 = pneg %p1736_p2 }
 0x619   : > { %p1743_p0 = por %p1742_p10, %p1741_p5 }
 0x61b   : > { %p1744_p3 = pnand %p1743_p0, %p1737_p6 }
 0x61d   : > { %1747 = shalt.err (!%p1744_p3)
}
 0x61e   : > { %1383 = dma.vmem_to_hbm [thread:$0]  (%p2601_p13), %s2409_s14, 128, %s2407_s22, %s1038_s13  }
 0x61f PF: > { %s2602_s16 = sld [smem:[#allocation25_spill]]  ;;  %s2603_s8 = sld [smem:[#allocation29_spill]] }
 0x620   : > { %p1418_p12 = scmp.ge.s32.totalorder %s1882_s26, 2 }
 0x625   : > { %s1083_s29 = sand.u32 1, %s2602_s16   ;;  %p2604_p7 = scmp.ne.s32.totalorder %s2603_s8, 0 }
 0x626   : > { %s1084_s11 = scalar_lea.sflag [#allocation7], %s1083_s29 }
 0x627   : > { %p1405_p9 = pnand %p1418_p12, %p2604_p7 }
 0x629   : > { %1821 = dma.done.wait (!%p1405_p9), %s1084_s11, 128  }
 0x62a   : > { %1823 = vsyncadd (!%p1405_p9), %s1084_s11, 4294967168  ;;  %s2605_s6 = sld [smem:[#allocation23_spill]]  ;;  %s2606_s23 = sld [smem:[#allocation31_spill]] }
 0x630   : > { %s1092_s30 = sand.u32 1, %s2605_s6   ;;  %p2607_p11 = scmp.ne.s32.totalorder %s2606_s23, 0 }
 0x631   : > { %s1093_s1 = scalar_lea.sflag [#allocation16], %s1092_s30 }
 0x632   : > { %p1408_p1 = pnand %p1418_p12, %p2607_p11 }
 0x634   : > { %1825 = dma.done.wait (!%p1408_p1), %s1093_s1, 128  }
 0x635   : > { %1827 = vsyncadd (!%p1408_p1), %s1093_s1, 4294967168  ;;  %s32_s26 = sadd.s32 1, %s1882_s26   ;;  %s2609_s13 = sld [smem:[#allocation24_spill]] }
 0x636   : > { %p2443_p13 = scmp.ge.s32.totalorder %s32_s26, 10   ;;  %s2610_s4 = sld [smem:[#allocation32_spill]] }
 0x637   : > { %s2611_s27 = sld [smem:[#allocation33_spill]]  ;;  %s2613_s14 = smov %s1838_s15 }
 0x638   : > { %s2614_s15 = smov %s2241_s19  ;;  %s2615_s16 = smov %s1846_s17 }
 0x639   : > { %s2616_s17 = smov %s1850_s18  ;;  %s2617_s18 = smov %s2230_s9 }
 0x63a   : > { %s2618_s19 = smov %s1858_s20  ;;  %s2619_s20 = smov %s1862_s21 }
 0x63b   : > { %s2620_s21 = smov %s2238_s0  ;;  %s2621_s22 = smov %s1874_s24 }
 0x63c   : > { %s2622_s23 = smov %s1878_s25  ;;  %s2623_s24 = smov %s2610_s4 }
 0x63d   : > { %s2624_s25 = smov %s2611_s27  ;;  %31 = sbr.rel (!%p2443_p13) target bundleno = 26 (0x1a), region = 157 }
 0x644   :  { %1098 = vsyncpa [#allocation6], 1 }
 0x645   :  { %1100 = vsyncpa [#allocation6 + $0x1], 1 }
 0x646   :  { %1101 = vsyncpa [#allocation9], 1 }
 0x647   :  { %1102 = vsyncpa [#allocation12], 1 }
 0x648   :  { %1103 = vsyncpa [#allocation7], 1 }
 0x649   :  { %1105 = vsyncpa [#allocation7 + $0x1], 1 }
 0x64a   :  { %1106 = vsyncpa [#allocation16], 1 }
 0x64b   :  { %1108 = vsyncpa [#allocation16 + $0x1], 1 }

</bundles_post_ra>
